<compile_context>
chip_gen: v5e
topology: v5e:2x2
jax: 0.10.0
libtpu: 0.0.40
codegen_flags: <defaults>
</compile_context>

<pallas_src>
import jax
import jax.numpy as jnp
from jax import lax
from jax.experimental import pallas as pl
from jax.experimental.pallas import tpu as pltpu


def _round_up(n, m):
    return ((n + m - 1) // m) * m


def _vmem_limit_bytes(tb, F, x_itemsize):
    """Padding-aware per-tile VMEM budget (bytes) for the compiler limit."""
    lanes = 128
    # x stream block: last dim (F=32) is lane-padded to 128 in VMEM (4x raw),
    # and the BlockSpec pipeline double-buffers it.
    x_stream = 2 * tb * max(F, lanes) * x_itemsize
    # Feature-major f32 temporaries: r(32) + h1(16) + pre2(8) + h2(8) + out(8-pad).
    interm = (32 + 16 + 8 + 8 + 8) * tb * 4
    # Output block (1, tb): sublane-padded to 8, double-buffered.
    out_stream = 2 * 8 * tb * 4
    total = x_stream + interm + out_stream
    # 25% headroom for compiler temporaries; cap for v7x's 64 MiB physical VMEM.
    return max(32 << 20, min(int(total * 1.25), 48 << 20))


def mlp_kernel(x_ref,
               wbig_ref, w2a_ref, w3a_ref,
               b1_ref, b2_ref, b3_ref,
               out_ref):
    # One fused MXU pass for every matmul that touches the raw (bn3-folded)
    # input.  x is consumed in its native (TILE_B, F) layout via a
    # transposed-RHS contraction -> no XLU transpose of the activation.
    # rows 0:16 -> fc1 pre-activation, 16:24 -> fc2's raw-input block,
    # row 24 -> out's raw-input block (rows 25:32 are zero padding).
    r = lax.dot_general(
        wbig_ref[...], x_ref[...],
        dimension_numbers=(((1,), (1,)), ((), ())),
        preferred_element_type=jnp.float32)                     # (32, TILE_B)

    # h1 = relu(fc1(xn));   bn1's affine is folded into w2a/b2 wrapper-side.
    h1 = jnp.maximum(r[0:16, :] + b1_ref[...], 0.0)             # (16, TILE_B)

    # pre2 = fc2(cat([bn1(h1), xn]));   dropout = identity in eval mode.
    pre2 = (jnp.dot(w2a_ref[...], h1, preferred_element_type=jnp.float32)
            + r[16:24, :] + b2_ref[...])                        # (8, TILE_B)
    h2 = jnp.maximum(pre2, 0.0)                                 # (8, TILE_B)

    # xout = out(cat([bn2(h2), xn]));  bn2 folded into w3a/b3 wrapper-side.
    # 1-wide output done as a cheap sublane reduction (XLU has slack here).
    xout = (jnp.sum(h2 * w3a_ref[...], axis=0, keepdims=True)
            + r[24:25, :] + b3_ref[...])                        # (1, TILE_B)
    out_ref[...] = xout.astype(out_ref.dtype)


def mlp_forward(x, fused_params, *, tile_b=16384):
    """x: [B, F] (float32 or bfloat16). Returns [B, 1] float32."""
    B, F = x.shape

    # Batch tile: multiple of 128 (lane-dense stores / (8,128) alignment),
    # capped by tile_b, and at most ceil(B/2) rounded up so that large batches
    # always produce >= 2 grid tiles (keeps v7x's second TensorCore busy).
    half = -(-B // 2)
    tb = min(int(tile_b), _round_up(half, 128))
    tb = _round_up(max(tb, 128), 128)

    Bp = _round_up(B, tb)
    if Bp != B:
        x = jnp.pad(x, ((0, Bp - B), (0, 0)))
    num_tiles = Bp // tb

    # bf16 streaming: keep the big input-consuming weight in x's dtype so the
    # MXU sees matching operands; f32 accumulation via preferred_element_type.
    wbig = fused_params[0].astype(x.dtype)
    params = (wbig,) + tuple(fused_params[1:])

    in_specs = [pl.BlockSpec((tb, F), lambda i: (i, 0))]        # stream x
    # Parameters: constant block index -> DMA'd once, VMEM-resident afterwards.
    in_specs += [pl.BlockSpec(p.shape, lambda i: (0, 0)) for p in params]

    out = pl.pallas_call(
        mlp_kernel,
        out_shape=jax.ShapeDtypeStruct((1, Bp), jnp.float32),
        grid=(num_tiles,),
        in_specs=in_specs,
        out_specs=pl.BlockSpec((1, tb), lambda i: (0, i)),      # lane-dense out
        compiler_params=pltpu.CompilerParams(
            dimension_semantics=("parallel",),
            vmem_limit_bytes=_vmem_limit_bytes(tb, F, x.dtype.itemsize)),
    )(x, *params)
    return out[0, :B].reshape(B, 1)


# ----------------------------------------------------------------------------
# Parameter construction (PyTorch layout), reference forward, and folding glue.
# ----------------------------------------------------------------------------

def _bn_affine(g, b, m, v, eps=1e-5):
    s = g / jnp.sqrt(v + eps)
    return s, b - m * s


def make_raw_params(key, input_size):
    """Deterministic init, shapes follow the PyTorch module (W is [out, in])."""
    F = input_size
    ks = jax.random.split(key, 18)

    def linear(kw, kb, fan_in, fan_out):
        bound = 1.0 / (fan_in ** 0.5)
        w = jax.random.uniform(kw, (fan_out, fan_in), jnp.float32, -bound, bound)
        b = jax.random.uniform(kb, (fan_out,), jnp.float32, -bound, bound)
        return w, b

    def bn(kg, kb_, km, kv, n):
        gamma = 1.0 + 0.1 * jax.random.normal(kg, (n,), jnp.float32)
        beta = 0.1 * jax.random.normal(kb_, (n,), jnp.float32)
        mean = 0.1 * jax.random.normal(km, (n,), jnp.float32)
        var = 0.5 + jax.random.uniform(kv, (n,), jnp.float32)
        return gamma, beta, mean, var

    W1, b1 = linear(ks[0], ks[1], F, 16)
    W2, b2 = linear(ks[2], ks[3], 16 + F, 8)
    W3, b3 = linear(ks[4], ks[5], 8 + F, 1)
    return dict(W1=W1, b1=b1, W2=W2, b2=b2, W3=W3, b3=b3,
                bn1=bn(ks[6], ks[7], ks[8], ks[9], 16),
                bn2=bn(ks[10], ks[11], ks[12], ks[13], 8),
                bn3=bn(ks[14], ks[15], ks[16], ks[17], F))


def fold_params(raw):
    """Fold all eval-mode BN affines into weights/biases and fuse the three
    raw-input matmuls (fc1, fc2's xn block, out's xn block) into one weight."""
    s3, t3 = _bn_affine(*raw["bn3"])
    s1, t1 = _bn_affine(*raw["bn1"])
    s2, t2 = _bn_affine(*raw["bn2"])
    W1, b1 = raw["W1"], raw["b1"]                 # (16, F), (16,)
    W2, b2 = raw["W2"], raw["b2"]                 # (8, 16+F), (8,)
    W3, b3 = raw["W3"], raw["b3"]                 # (1, 8+F), (1,)

    W2a, W2b = W2[:, :16], W2[:, 16:]             # concat-as-weight-split
    W3a, W3b = W3[:, :8], W3[:, 8:]

    W_xn = jnp.concatenate([W1, W2b, W3b], axis=0)          # (25, F)
    W_big = W_xn * s3[None, :]                              # fold bn3 scale
    c = W_xn @ t3                                           # fold bn3 shift, (25,)
    W_big = jnp.pad(W_big, ((0, 32 - W_big.shape[0]), (0, 0)))  # -> (32, F)

    # Fold bn1 into fc2's x1-block, bn2 into the out-layer's x3-block.
    W2a_eff = W2a * s1[None, :]                             # (8, 16)
    W3a_eff = (W3a[0, :] * s2).reshape(8, 1)                # (8, 1)

    b1e = (b1 + c[0:16]).reshape(16, 1)
    b2e = (b2 + c[16:24] + W2a @ t1).reshape(8, 1)
    b3e = (b3 + c[24:25] + W3a @ t2).reshape(1, 1)

    return (W_big, W2a_eff, W3a_eff, b1e, b2e, b3e)


def mlp_reference(x, raw):
    """Straightforward JAX mirror of the PyTorch forward (eval mode)."""
    s3, t3 = _bn_affine(*raw["bn3"])
    s1, t1 = _bn_affine(*raw["bn1"])
    s2, t2 = _bn_affine(*raw["bn2"])
    xn = x * s3 + t3
    x1 = jnp.maximum(xn @ raw["W1"].T + raw["b1"], 0.0) * s1 + t1
    x2 = jnp.concatenate([x1, xn], axis=1)
    x3 = jnp.maximum(x2 @ raw["W2"].T + raw["b2"], 0.0) * s2 + t2
    x4 = jnp.concatenate([x3, xn], axis=1)
    return x4 @ raw["W3"].T + raw["b3"]


if __name__ == "__main__":
    input_size = 32
    batch = 8

    key = jax.random.PRNGKey(0)
    kx, kp, kx2 = jax.random.split(key, 3)
    raw = make_raw_params(kp, input_size)
    fused = fold_params(raw)

    # Primary small-shape run (single tile).
    x = jax.random.normal(kx, (batch, input_size), jnp.float32)
    out = jax.block_until_ready(mlp_forward(x, fused))
    ref = mlp_reference(x, raw)
    assert out.shape == (batch, 1)
    # Tolerance covers TPU default matmul precision + BN-folding reassociation.
    assert jnp.allclose(out, ref, atol=2e-2, rtol=2e-2), "mismatch vs reference"

    # Secondary check exercising the multi-tile grid + batch padding path.
    x2 = jax.random.normal(kx2, (600, input_size), jnp.float32)
    out2 = jax.block_until_ready(mlp_forward(x2, fused, tile_b=256))
    ref2 = mlp_reference(x2, raw)
    assert out2.shape == (600, 1)
    assert jnp.allclose(out2, ref2, atol=2e-2, rtol=2e-2), "mismatch (tiled)"

    # bf16-streamed input path (halves HBM read traffic; f32 accumulation).
    xb = x2.astype(jnp.bfloat16)
    out3 = jax.block_until_ready(mlp_forward(xb, fused, tile_b=256))
    ref3 = mlp_reference(xb.astype(jnp.float32), raw)
    assert out3.shape == (600, 1)
    assert jnp.allclose(out3, ref3, atol=6e-2, rtol=6e-2), "mismatch (bf16)"

    print("KERNEL_OK")
</pallas_src>

<mosaic_0001>
module attributes {stable_mosaic.version = 11 : i64} {
  func.func @mlp_kernel(%arg0: i32, %arg1: memref<128x32xf32, #tpu.memory_space<vmem>>, %arg2: memref<32x32xf32, #tpu.memory_space<vmem>>, %arg3: memref<8x16xf32, #tpu.memory_space<vmem>>, %arg4: memref<8x1xf32, #tpu.memory_space<vmem>>, %arg5: memref<16x1xf32, #tpu.memory_space<vmem>>, %arg6: memref<8x1xf32, #tpu.memory_space<vmem>>, %arg7: memref<1x1xf32, #tpu.memory_space<vmem>>, %arg8: memref<1x128xf32, #tpu.memory_space<vmem>>) attributes {dimension_semantics = [#tpu.dimension_semantics<parallel>], iteration_bounds = array<i64: 1>, scalar_prefetch = 0 : i64, scratch_operands = 0 : i64, tpu.core_type = #tpu.core_type<tc>, window_params = [{transform_indices = @transform_0, window_bounds = array<i64: 128, 32>}, {pipeline_mode = #tpu.pipeline_mode<synchronous>, transform_indices = @transform_1, window_bounds = array<i64: 32, 32>}, {pipeline_mode = #tpu.pipeline_mode<synchronous>, transform_indices = @transform_2, window_bounds = array<i64: 8, 16>}, {pipeline_mode = #tpu.pipeline_mode<synchronous>, transform_indices = @transform_3, window_bounds = array<i64: 8, 1>}, {pipeline_mode = #tpu.pipeline_mode<synchronous>, transform_indices = @transform_4, window_bounds = array<i64: 16, 1>}, {pipeline_mode = #tpu.pipeline_mode<synchronous>, transform_indices = @transform_5, window_bounds = array<i64: 8, 1>}, {pipeline_mode = #tpu.pipeline_mode<synchronous>, transform_indices = @transform_6, window_bounds = array<i64: 1, 1>}, {transform_indices = @transform_7, window_bounds = array<i64: 1, 128>}]} {
    %c0 = arith.constant 0 : index
    %c0_0 = arith.constant 0 : index
    %0 = vector.load %arg2[%c0, %c0_0] : memref<32x32xf32, #tpu.memory_space<vmem>>, vector<32x32xf32>
    %c0_1 = arith.constant 0 : index
    %c0_2 = arith.constant 0 : index
    %1 = vector.load %arg1[%c0_1, %c0_2] : memref<128x32xf32, #tpu.memory_space<vmem>>, vector<128x32xf32>
    %cst = arith.constant dense<0.000000e+00> : vector<32x128xf32>
    %2 = tpu.matmul %0, %1, %cst {dimension_numbers = #tpu.dot_dimension_numbers<[1], [1], [0], [0], [0, 0, 1, 0], [], []>} : vector<32x32xf32>, vector<128x32xf32>, vector<32x128xf32> -> vector<32x128xf32>
    %3 = vector.extract_strided_slice %2 {offsets = [0, 0], sizes = [16, 128], strides = [1, 1]} : vector<32x128xf32> to vector<16x128xf32>
    %c0_3 = arith.constant 0 : index
    %c0_4 = arith.constant 0 : index
    %4 = vector.load %arg5[%c0_3, %c0_4] : memref<16x1xf32, #tpu.memory_space<vmem>>, vector<16x1xf32>
    %5 = vector.broadcast %4 : vector<16x1xf32> to vector<16x128xf32>
    %6 = arith.addf %3, %5 : vector<16x128xf32>
    %cst_5 = arith.constant 0.000000e+00 : f32
    %7 = vector.broadcast %cst_5 : f32 to vector<16x128xf32>
    %8 = arith.maximumf %6, %7 : vector<16x128xf32>
    %c0_6 = arith.constant 0 : index
    %c0_7 = arith.constant 0 : index
    %9 = vector.load %arg3[%c0_6, %c0_7] : memref<8x16xf32, #tpu.memory_space<vmem>>, vector<8x16xf32>
    %cst_8 = arith.constant dense<0.000000e+00> : vector<8x128xf32>
    %10 = tpu.matmul %9, %8, %cst_8 {dimension_numbers = #tpu.dot_dimension_numbers<[1], [0], [0], [1], [0, 0, 1, 1], [], []>} : vector<8x16xf32>, vector<16x128xf32>, vector<8x128xf32> -> vector<8x128xf32>
    %11 = vector.extract_strided_slice %2 {offsets = [16, 0], sizes = [8, 128], strides = [1, 1]} : vector<32x128xf32> to vector<8x128xf32>
    %12 = arith.addf %10, %11 : vector<8x128xf32>
    %c0_9 = arith.constant 0 : index
    %c0_10 = arith.constant 0 : index
    %13 = vector.load %arg6[%c0_9, %c0_10] : memref<8x1xf32, #tpu.memory_space<vmem>>, vector<8x1xf32>
    %14 = vector.broadcast %13 : vector<8x1xf32> to vector<8x128xf32>
    %15 = arith.addf %12, %14 : vector<8x128xf32>
    %cst_11 = arith.constant 0.000000e+00 : f32
    %16 = vector.broadcast %cst_11 : f32 to vector<8x128xf32>
    %17 = arith.maximumf %15, %16 : vector<8x128xf32>
    %c0_12 = arith.constant 0 : index
    %c0_13 = arith.constant 0 : index
    %18 = vector.load %arg4[%c0_12, %c0_13] : memref<8x1xf32, #tpu.memory_space<vmem>>, vector<8x1xf32>
    %19 = vector.broadcast %18 : vector<8x1xf32> to vector<8x128xf32>
    %20 = arith.mulf %17, %19 : vector<8x128xf32>
    %cst_14 = arith.constant dense<0.000000e+00> : vector<128xf32>
    %21 = vector.multi_reduction <add>, %20, %cst_14 [0] : vector<8x128xf32> to vector<128xf32>
    %22 = vector.shape_cast %21 : vector<128xf32> to vector<1x128xf32>
    %23 = vector.extract_strided_slice %2 {offsets = [24, 0], sizes = [1, 128], strides = [1, 1]} : vector<32x128xf32> to vector<1x128xf32>
    %24 = arith.addf %22, %23 : vector<1x128xf32>
    %c0_15 = arith.constant 0 : index
    %c0_16 = arith.constant 0 : index
    %25 = vector.load %arg7[%c0_15, %c0_16] : memref<1x1xf32, #tpu.memory_space<vmem>>, vector<1x1xf32>
    %26 = vector.broadcast %25 : vector<1x1xf32> to vector<1x128xf32>
    %27 = arith.addf %24, %26 : vector<1x128xf32>
    %c0_17 = arith.constant 0 : index
    %c0_18 = arith.constant 0 : index
    %28 = vector.load %arg8[%c0_17, %c0_18] : memref<1x128xf32, #tpu.memory_space<vmem>>, vector<1x128xf32>
    tpu.vector_store %arg8[%c0_17, %c0_18], %27 {strides = array<i32>} : memref<1x128xf32, #tpu.memory_space<vmem>>, vector<1x128xf32>,
    return
  }
  func.func @transform_0(%arg0: i32) -> (i32, i32) {
    %c0_i32 = arith.constant 0 : i32
    %c0_i32_0 = arith.constant 0 : i32
    return %arg0, %c0_i32 : i32, i32
  }
  func.func @transform_1(%arg0: i32) -> (i32, i32) {
    %c0_i32 = arith.constant 0 : i32
    %c0_i32_0 = arith.constant 0 : i32
    %c0_i32_1 = arith.constant 0 : i32
    return %c0_i32, %c0_i32_0 : i32, i32
  }
  func.func @transform_2(%arg0: i32) -> (i32, i32) {
    %c0_i32 = arith.constant 0 : i32
    %c0_i32_0 = arith.constant 0 : i32
    %c0_i32_1 = arith.constant 0 : i32
    return %c0_i32, %c0_i32_0 : i32, i32
  }
  func.func @transform_3(%arg0: i32) -> (i32, i32) {
    %c0_i32 = arith.constant 0 : i32
    %c0_i32_0 = arith.constant 0 : i32
    %c0_i32_1 = arith.constant 0 : i32
    return %c0_i32, %c0_i32_0 : i32, i32
  }
  func.func @transform_4(%arg0: i32) -> (i32, i32) {
    %c0_i32 = arith.constant 0 : i32
    %c0_i32_0 = arith.constant 0 : i32
    %c0_i32_1 = arith.constant 0 : i32
    return %c0_i32, %c0_i32_0 : i32, i32
  }
  func.func @transform_5(%arg0: i32) -> (i32, i32) {
    %c0_i32 = arith.constant 0 : i32
    %c0_i32_0 = arith.constant 0 : i32
    %c0_i32_1 = arith.constant 0 : i32
    return %c0_i32, %c0_i32_0 : i32, i32
  }
  func.func @transform_6(%arg0: i32) -> (i32, i32) {
    %c0_i32 = arith.constant 0 : i32
    %c0_i32_0 = arith.constant 0 : i32
    %c0_i32_1 = arith.constant 0 : i32
    return %c0_i32, %c0_i32_0 : i32, i32
  }
  func.func @transform_7(%arg0: i32) -> (i32, i32) {
    %c0_i32 = arith.constant 0 : i32
    %c0_i32_0 = arith.constant 0 : i32
    return %c0_i32, %arg0 : i32, i32
  }
}

</mosaic_0001>

<bundles_post_ra>
// kernel: tpu_custom_call.1
= control target key start
LH: loop header
LB: loop body
LE: loop exit
PB: predicated region body
PF: predicated region fallthrough
CT: control target
= control target key end

     0   :  { %s486_s0 = inlined_call_operand.vmem [shape: f32[128,32], index: 0, kind: input, shape index: {}]   ;;  %s487_s1 = inlined_call_operand.vmem [shape: f32[32,32], index: 1, kind: input, shape index: {}]   ;;  %s488_s2 = inlined_call_operand.vmem [shape: f32[8,16], index: 2, kind: input, shape index: {}]   ;;  %s489_s3 = inlined_call_operand.vmem [shape: f32[8,1], index: 3, kind: input, shape index: {}]   ;;  %s490_s4 = inlined_call_operand.vmem [shape: f32[16,1], index: 4, kind: input, shape index: {}]   ;;  %s491_s5 = inlined_call_operand.vmem [shape: f32[8,1], index: 5, kind: input, shape index: {}]   ;;  %s492_s6 = inlined_call_operand.<no memory space> [shape: f32[1,1], index: 6, kind: input, shape index: {}]   ;;  %s493_s7 = inlined_call_operand.hbm [shape: f32[1,128], index: 7, kind: output, shape index: {}]  }
   0x1   :  { %v12_v0 = vstv %s492_s6 }
   0x2   :  { %13 = vst [vmem:[#allocation2] sm:$0x1] %v12_v0 }
   0x3   :  { %v48_v1 = vld [vmem:[%s486_s0 + $0x78] sm:$0xff]  ;;  %vm49_vm0 = vcmask 261120   ;;  %v47_v2 = vld [vmem:[%s486_s0 + $0x70] sm:$0xff] }
   0x4   :  { %227 = vmatpush.xpose.msk.msra.mxu0 %vm49_vm0, %v48_v1  ;;  %248 = vmatpush.xpose.msk.msra.mxu2 %vm49_vm0, %v48_v1 }
   0x5   :  { %249 = vmatpush.xpose.msk.msra.mxu3 %vm49_vm0, %v48_v1 }
   0x6   :  { %14 = vsyncpa [#allocation4], 0  ;;  %v46_v3 = vld [vmem:[%s486_s0 + $0x68] sm:$0xff]  ;;  %v45_v4 = vld [vmem:[%s486_s0 + $0x60] sm:$0xff]  ;;  %v311_v12 = vmov 0   ;;  %vm156_vm1 = vcmask 130048  }
   0x7   :  { %v44_v5 = vld [vmem:[%s486_s0 + $0x58] sm:$0xff]  ;;  %v43_v6 = vld [vmem:[%s486_s0 + $0x50] sm:$0xff]  ;;  %v42_v7 = vld [vmem:[%s486_s0 + $0x48] sm:$0xff]  ;;  %282 = vset.pattern.permute.xlu0 %v311_v12  ;;  %283 = vset.pattern.permute.xlu1 %v311_v12  ;;  %s218_s26 = sshll.u32 %s493_s7, 4  ;;  %s219_s26 = int_to_ptr.hbm [resolvable:$true] %s218_s26 }
   0x8   :  { %228 = vmatpush.xpose.msk.msra.mxu0 %vm49_vm0, %v47_v2  ;;  %250 = vmatpush.xpose.msk.msra.mxu2 %vm49_vm0, %v47_v2  ;;  %v41_v8 = vld [vmem:[%s486_s0 + $0x40] sm:$0xff]  ;;  %v40_v9 = vld [vmem:[%s486_s0 + $0x38] sm:$0xff]  ;;  %v140_v10 = vld [vmem:[%s490_s4 + $0x8] sm:$0xff] }
   0x9   :  { %251 = vmatpush.xpose.msk.msra.mxu3 %vm49_vm0, %v47_v2  ;;  %v39_v11 = vld [vmem:[%s486_s0 + $0x30] sm:$0xff]  ;;  %148 = vperm.xlu0 %282, %v140_v10   ;;  %v38_v13 = vld [vmem:[%s486_s0 + $0x28] sm:$0xff]  ;;  %v139_v14 = vld [vmem:[%s490_s4] sm:$0xff] }
   0xa   :  { %284 = vset.pattern.permute.xlu2 %v311_v12  ;;  %v37_v15 = vld [vmem:[%s486_s0 + $0x20] sm:$0xff]  ;;  %v36_v16 = vld [vmem:[%s486_s0 + $0x18] sm:$0xff]  ;;  %v35_v17 = vld [vmem:[%s486_s0 + $0x10] sm:$0xff] }
   0xb   :  { %v34_v18 = vld [vmem:[%s486_s0 + $0x8] sm:$0xff]  ;;  %v33_v19 = vld [vmem:[%s486_s0] sm:$0xff]  ;;  %v31_v22 = vld [vmem:[%s487_s1 + $0x10] sm:$0xff] }
   0xc   :  { %229 = vmatpush.xpose.msk.msra.mxu0 %vm49_vm0, %v46_v3  ;;  %252 = vmatpush.xpose.msk.msra.mxu2 %vm49_vm0, %v46_v3  ;;  %v29_v20 = vld [vmem:[%s487_s1] sm:$0xff]  ;;  %v30_v21 = vld [vmem:[%s487_s1 + $0x8] sm:$0xff]  ;;  %v32_v24 = vld [vmem:[%s487_s1 + $0x18] sm:$0xff] }
   0xd   :  { %253 = vmatpush.xpose.msk.msra.mxu3 %vm49_vm0, %v46_v3  ;;  %v180_v23 = vld [vmem:[%s491_s5] sm:$0xff] }
   0xe   :  { %183 = vperm.xlu1 %283, %v180_v23   ;;  %v202_v25 = vld [vmem:[#allocation2] sm:$0x1] }
   0xf   :  { %205 = vperm.xlu2 %284, %v202_v25   ;;  %v188_v26 = vld [vmem:[%s489_s3] sm:$0xff] }
  0x10   :  { %230 = vmatpush.xpose.msk.msra.mxu0 %vm49_vm0, %v45_v4  ;;  %254 = vmatpush.xpose.msk.msra.mxu2 %vm49_vm0, %v45_v4  ;;  %v155_v35 = vld [vmem:[%s488_s2] sm:$0xff]  ;;  %s312_s2 = smov [#allocation3]  }
  0x11   :  { %255 = vmatpush.xpose.msk.msra.mxu3 %vm49_vm0, %v45_v4  ;;  %143 = vperm.xlu0 %282, %v139_v14   ;;  %s216_s3 = sshll.u32 %s312_s2, 4  ;;  %s217_s3 = int_to_ptr.vmem [resolvable:$true] %s216_s3 }
  0x14   :  { %231 = vmatpush.xpose.msk.msra.mxu0 %vm49_vm0, %v44_v5  ;;  %256 = vmatpush.xpose.msk.msra.mxu2 %vm49_vm0, %v44_v5 }
  0x15   :  { %257 = vmatpush.xpose.msk.msra.mxu3 %vm49_vm0, %v44_v5 }
  0x16   :  { %191 = vperm.xlu1 %283, %v188_v26  }
  0x18   :  { %232 = vmatpush.xpose.msk.msra.mxu0 %vm49_vm0, %v43_v6  ;;  %258 = vmatpush.xpose.msk.msra.mxu2 %vm49_vm0, %v43_v6 }
  0x19   :  { %259 = vmatpush.xpose.msk.msra.mxu3 %vm49_vm0, %v43_v6 }
  0x1c   :  { %233 = vmatpush.xpose.msk.msra.mxu0 %vm49_vm0, %v42_v7  ;;  %260 = vmatpush.xpose.msk.msra.mxu2 %vm49_vm0, %v42_v7 }
  0x1d   :  { %261 = vmatpush.xpose.msk.msra.mxu3 %vm49_vm0, %v42_v7 }
  0x20   :  { %234 = vmatpush.xpose.msk.msra.mxu0 %vm49_vm0, %v41_v8  ;;  %262 = vmatpush.xpose.msk.msra.mxu2 %vm49_vm0, %v41_v8 }
  0x21   :  { %263 = vmatpush.xpose.msk.msra.mxu3 %vm49_vm0, %v41_v8 }
  0x24   :  { %235 = vmatpush.xpose.msk.msra.mxu0 %vm49_vm0, %v40_v9  ;;  %264 = vmatpush.xpose.msk.msra.mxu2 %vm49_vm0, %v40_v9 }
  0x25   :  { %265 = vmatpush.xpose.msk.msra.mxu3 %vm49_vm0, %v40_v9 }
  0x28   :  { %236 = vmatpush.xpose.msk.msra.mxu0 %vm49_vm0, %v39_v11  ;;  %266 = vmatpush.xpose.msk.msra.mxu2 %vm49_vm0, %v39_v11 }
  0x29   :  { %267 = vmatpush.xpose.msk.msra.mxu3 %vm49_vm0, %v39_v11 }
  0x2c   :  { %237 = vmatpush.xpose.msk.msra.mxu0 %vm49_vm0, %v38_v13  ;;  %268 = vmatpush.xpose.msk.msra.mxu2 %vm49_vm0, %v38_v13 }
  0x2d   :  { %269 = vmatpush.xpose.msk.msra.mxu3 %vm49_vm0, %v38_v13 }
  0x30   :  { %238 = vmatpush.xpose.msk.msra.mxu0 %vm49_vm0, %v37_v15  ;;  %270 = vmatpush.xpose.msk.msra.mxu2 %vm49_vm0, %v37_v15 }
  0x31   :  { %271 = vmatpush.xpose.msk.msra.mxu3 %vm49_vm0, %v37_v15 }
  0x34   :  { %239 = vmatpush.xpose.msk.msra.mxu0 %vm49_vm0, %v36_v16  ;;  %272 = vmatpush.xpose.msk.msra.mxu2 %vm49_vm0, %v36_v16 }
  0x35   :  { %273 = vmatpush.xpose.msk.msra.mxu3 %vm49_vm0, %v36_v16 }
  0x38   :  { %240 = vmatpush.xpose.msk.msra.mxu0 %vm49_vm0, %v35_v17  ;;  %274 = vmatpush.xpose.msk.msra.mxu2 %vm49_vm0, %v35_v17 }
  0x39   :  { %275 = vmatpush.xpose.msk.msra.mxu3 %vm49_vm0, %v35_v17 }
  0x3c   :  { %241 = vmatpush.xpose.msk.msra.mxu0 %vm49_vm0, %v34_v18  ;;  %276 = vmatpush.xpose.msk.msra.mxu2 %vm49_vm0, %v34_v18 }
  0x3d   :  { %277 = vmatpush.xpose.msk.msra.mxu3 %vm49_vm0, %v34_v18 }
  0x40   :  { %242 = vmatpush.xpose.msk.msra.mxu0 %vm49_vm0, %v33_v19  ;;  %278 = vmatpush.xpose.msk.msra.mxu2 %vm49_vm0, %v33_v19 }
  0x41   :  { %279 = vmatpush.xpose.msk.msra.mxu3 %vm49_vm0, %v33_v19 }
  0x43   :  { %243 = vmatmul.msk.f32.vlgmr.msra.gmra.mxu0 %vm49_vm0, %v29_v20  ;;  %244 = vmatmul.msk.f32.vlgmr.msra.gmra.mxu2 %vm49_vm0, %v30_v21 }
  0x44   :  { %245 = vmatmul.msk.f32.vlgmr.msra.gmra.mxu3 %vm49_vm0, %v31_v22 }
  0x4c   :  { %246 = vmatmul.msk.f32.gmra.mxu3 %vm49_vm0, %v32_v24 }
  0x69   :  { %v206_v48 = vpop.permute.xlu2 %205 }
  0x6a   :  { %v208_v51 = vperm.slane %v206_v48, 0 }
  0x7b   :  { %v149_v27 = vpop.permute.xlu0 %148 }
  0x80   :  { %v184_v36 = vpop.permute.xlu1 %183 }
  0x83   :  { %v144_v28 = vpop.permute.xlu0 %143 }
  0x88   :  { %v192_v42 = vpop.permute.xlu1 %191 }
  0xc0   :  { %v127_v29 = vpop.f32.mrf.mxu0 }
  0xc1   :  { %v151_v31 = vadd.f32 %v144_v28, %v127_v29 }
  0xc3   :  { %v153_v34 = vmax.f32 %v151_v31, 0.0 }
  0xc6   :  { %v130_v30 = vpop.f32.mrf.mxu2 }
  0xc7   :  { %v152_v32 = vadd.f32 %v149_v27, %v130_v30  ;;  %v133_v37 = vpop.f32.mrf.mxu3 }
  0xc9   :  { %v154_v33 = vmax.f32 %v152_v32, 0.0 }
  0xcb   :  { %174 = vmatpush.msra.mxu1 %v154_v33 }
  0xcd   :  { %175 = vmatpush.msra.mxu1 %v153_v34 }
  0xce   :  { %247 = vmatmul.msk.f32.vlgmr.msra.gmra.mxu1 %vm156_vm1, %v155_v35 }
  0xcf   :  { %v136_v50 = vpop.f32.mrf.mxu3 }
 0x14b   :  { %v177_v38 = vpop.f32.mrf.mxu1 }
 0x14c   :  { %v178_v39 = vadd.f32 %v177_v38, %v133_v37 }
 0x14e   :  { %v186_v40 = vadd.f32 %v184_v36, %v178_v39 }
 0x150   :  { %v187_v41 = vmax.f32 %v186_v40, 0.0 }
 0x152   :  { %v194_v43 = vmul.f32 %v192_v42, %v187_v41 }
 0x154   :  { %v195_v44 = vrot.slane %v194_v43, 4 }
 0x156   :  { %v196_v45 = vadd.f32 %v195_v44, %v194_v43 }
 0x158   :  { %v197_v46 = vrot.slane %v196_v45, 2 }
 0x15a   :  { %v198_v47 = vadd.f32 %v197_v46, %v196_v45 }
 0x15c   :  { %v199_v49 = vrot.slane %v198_v47, 1 }
 0x15e   :  { %v200_v52 = vadd.f32 %v199_v49, %v198_v47 }
 0x160   :  { %v201_v53 = vadd.f32 %v200_v52, %v136_v50 }
 0x162   :  { %v209_v54 = vadd.f32 %v208_v51, %v201_v53 }
 0x164   :  { %210 = vst [vmem:[#allocation3] sm:$0x1] %v209_v54 }
 0x165   :  { %221 = dma.vmem_to_hbm [thread:$0]  %s217_s3, 16, %s219_s26, [#allocation4]  }
 0x166   :  { %309 = dma.done.wait [#allocation4], 16  }
 0x167   :  { %310 = vsyncadd [#allocation4], 4294967280 }
 0x168   :  { %226 = vsyncpa [#allocation4], 1 }

</bundles_post_ra>
